<compile_context>
chip_gen: v7x
topology: tpu7x:2x2x1
jax: 0.10.0
libtpu: 0.0.40
codegen_flags: <defaults>
</compile_context>

<pallas_src>
import math
import jax
import jax.numpy as jnp
from jax.experimental import pallas as pl
from jax.experimental.pallas import tpu as pltpu

# ----------------------------- small config -----------------------------------
VIT_DIM = 32                 # stand-in for vision_tower hidden_size (1024 in real model)
PATCH = 4
NUM_LAYERS = 4               # stand-in for the 24 CLIP layers
INTERACTION_IDX = [1, 2, 3, 4]   # stand-in for [2, 6, 12, 20]
CONV_DIMS = [8, 16, 32, 48]      # stand-in for [192, 384, 768, 1536]

LANE = 128                   # TPU lane width
ROW_TILE = 256               # target token-row tile (sublane multiple)
HID_TILE = 512               # target hidden-chunk tile (lane multiple)


def _round_up(x, m):
    return ((x + m - 1) // m) * m


def _pad2(a, rows, cols):
    return jnp.pad(a, ((0, rows - a.shape[0]), (0, cols - a.shape[1])))


# ----------------------------- Pallas CVFM kernel --------------------------------
def cvfm_apply(vit, conv_feat, p):
    """vit: [B, N, D] ; conv_feat: [B, C, Hc, Wc] (NCHW). Returns [B, N, D]."""
    B, N, D = vit.shape
    h = w = int(round((N - 1) ** 0.5))

    # F.interpolate(..., mode='bilinear', align_corners=False)  (glue)
    # NOTE: interpolation runs in vit.dtype (f32 here) which matches PyTorch.
    al = _bilinear_resize_nchw(conv_feat.astype(vit.dtype), h, w)      # [B, C, h, w]
    C = al.shape[1]
    al = al.reshape(B, C, h * w).transpose(0, 2, 1)                    # [B, h*w, C]
    cls = al.mean(axis=1, keepdims=True)                               # [B, 1, C]
    al = jnp.concatenate([cls, al], axis=1)                            # [B, N, C]

    # -------- padded / flattened TPU layout --------
    rows = B * N
    DP = _round_up(D, LANE)                  # padded vit dim (lane-dense output)
    CP = _round_up(C, LANE)                  # padded conv dim (MXU K alignment)
    HP = _round_up(4 * D, LANE)              # padded hidden dim
    TM = min(ROW_TILE, _round_up(rows, 8))   # row tile (sublane multiple)
    rows_p = _round_up(rows, TM)
    TH = next(t for t in (HID_TILE, 384, 256, 128) if HP % t == 0)

    vit_p = _pad2(vit.reshape(rows, D).astype(jnp.float32), rows_p, DP)     # f32 (residual)
    al_p = _pad2(al.reshape(rows, C), rows_p, CP).astype(jnp.bfloat16)      # bf16 MXU operand

    # Split-K first linear (no explicit concat): combined @ W1 == vit@W1[:D] + al@W1[D:]
    w1v = _pad2(p["w1"][:D], DP, HP).astype(jnp.bfloat16)
    w1c = _pad2(p["w1"][D:], CP, HP).astype(jnp.bfloat16)
    w2 = _pad2(p["w2"], HP, DP).astype(jnp.bfloat16)
    b1 = _pad2(p["b1"].reshape(1, -1).astype(jnp.float32), 1, HP)
    b2 = _pad2(p["b2"].reshape(1, -1).astype(jnp.float32), 1, DP)
    lng = _pad2(p["ln_g"].reshape(1, -1).astype(jnp.float32), 1, DP)   # padded lanes = 0
    lnb = _pad2(p["ln_b"].reshape(1, -1).astype(jnp.float32), 1, DP)
    gate_t = jnp.tanh(p["gate"]).reshape(1, 1).astype(jnp.float32)     # SMEM scalar

    inv_d = 1.0 / float(D)
    inv_sqrt2 = 1.0 / math.sqrt(2.0)

    def kernel(gate_ref, vit_ref, al_ref, w1v_ref, w1c_ref, b1_ref,
               w2_ref, b2_ref, lng_ref, lnb_ref, o_ref, acc_ref):
        hc = pl.program_id(1)

        @pl.when(hc == 0)
        def _init():
            acc_ref[...] = jnp.zeros_like(acc_ref)

        vit_f32 = vit_ref[...]                                        # [TM, DP] f32

        # --- Linear(D+C -> 4D), one TH-wide hidden chunk, bf16 MXU / f32 acc ---
        h1 = (jnp.dot(vit_f32.astype(jnp.bfloat16), w1v_ref[...],
                      preferred_element_type=jnp.float32)
              + jnp.dot(al_ref[...], w1c_ref[...],
                        preferred_element_type=jnp.float32)
              + b1_ref[...])
        # exact (erf) GELU in f32, matching nn.GELU() default
        h1 = 0.5 * h1 * (1.0 + jax.lax.erf(h1 * inv_sqrt2))

        # --- Linear(4D -> D): accumulate over hidden chunks ---
        acc_ref[...] += jnp.dot(h1.astype(jnp.bfloat16), w2_ref[...],
                                preferred_element_type=jnp.float32)

        @pl.when(hc == pl.num_programs(1) - 1)
        def _finalize():
            g = gate_ref[0, 0]                                        # tanh(gate) scalar
            y = vit_f32 + g * (acc_ref[...] + b2_ref[...])            # gated residual (f32)
            # LayerNorm over the valid D lanes only (padded lanes are zero).
            lane = jax.lax.broadcasted_iota(jnp.int32, y.shape, 1)
            valid = lane < D
            mu = jnp.sum(jnp.where(valid, y, 0.0), axis=-1, keepdims=True) * inv_d
            diff = jnp.where(valid, y - mu, 0.0)
            var = jnp.sum(diff * diff, axis=-1, keepdims=True) * inv_d
            yn = diff * jax.lax.rsqrt(var + 1e-5)
            o_ref[...] = (yn * lng_ref[...] + lnb_ref[...]).astype(o_ref.dtype)

    grid = (rows_p // TM, HP // TH)

    cost = pl.CostEstimate(
        flops=2 * rows * (DP + CP) * HP + 2 * rows * HP * DP,
        transcendentals=rows * HP,
        bytes_accessed=(vit_p.size * 4 + al_p.size * 2
                        + (w1v.size + w1c.size + w2.size) * 2
                        + (b1.size + b2.size + lng.size + lnb.size) * 4
                        + rows_p * DP * 4),
    )

    out_p = pl.pallas_call(
        kernel,
        out_shape=jax.ShapeDtypeStruct((rows_p, DP), jnp.float32),
        grid_spec=pltpu.PrefetchScalarGridSpec(
            num_scalar_prefetch=0,
            grid=grid,
            in_specs=[
                pl.BlockSpec(memory_space=pltpu.MemorySpace.SMEM),     # tanh(gate) (1,1)
                pl.BlockSpec((TM, DP), lambda r, k: (r, 0)),           # vit rows   (f32)
                pl.BlockSpec((TM, CP), lambda r, k: (r, 0)),           # aligned rows (bf16)
                pl.BlockSpec((DP, TH), lambda r, k: (0, k)),           # W1[:D] chunk
                pl.BlockSpec((CP, TH), lambda r, k: (0, k)),           # W1[D:] chunk
                pl.BlockSpec((1, TH), lambda r, k: (0, k)),            # b1 chunk
                pl.BlockSpec((TH, DP), lambda r, k: (k, 0)),           # W2 chunk
                pl.BlockSpec((1, DP), lambda r, k: (0, 0)),            # b2
                pl.BlockSpec((1, DP), lambda r, k: (0, 0)),            # ln gamma
                pl.BlockSpec((1, DP), lambda r, k: (0, 0)),            # ln beta
            ],
            out_specs=pl.BlockSpec((TM, DP), lambda r, k: (r, 0)),
            scratch_shapes=[pltpu.VMEM((TM, DP), jnp.float32)],        # f32 accumulator
        ),
        compiler_params=pltpu.CompilerParams(
            dimension_semantics=("parallel", "arbitrary"),
            vmem_limit_bytes=64 * 1024 * 1024,
        ),
        cost_estimate=cost,
    )(gate_t, vit_p, al_p, w1v, w1c, b1, w2, b2, lng, lnb)

    # TODO(synk): cross-pallas_call prefetch (P10) of the next interaction layer's
    # W1/W2 during the intervening frozen ViT blocks is not implemented.
    return out_p[:rows, :D].reshape(B, N, D).astype(vit.dtype)


# ----------------------------- plain-JAX glue -----------------------------------
def _bilinear_resize_nchw(x, oh, ow):
    """Matches torch F.interpolate(mode='bilinear', align_corners=False) exactly."""
    B, C, H, W = x.shape

    def coords(out, size):
        s = (jnp.arange(out, dtype=jnp.float32) + 0.5) * (size / out) - 0.5
        s = jnp.maximum(s, 0.0)
        i0 = jnp.minimum(jnp.floor(s).astype(jnp.int32), size - 1)
        i1 = jnp.minimum(i0 + 1, size - 1)
        lam = s - i0.astype(jnp.float32)
        return i0, i1, lam

    y0, y1, wy = coords(oh, H)
    x0, x1, wx = coords(ow, W)
    r0 = x[:, :, y0, :]
    r1 = x[:, :, y1, :]
    rows = r0 * (1.0 - wy)[None, None, :, None] + r1 * wy[None, None, :, None]
    c0 = rows[:, :, :, x0]
    c1 = rows[:, :, :, x1]
    return c0 * (1.0 - wx)[None, None, None, :] + c1 * wx[None, None, None, :]


def convnext_stages(p, x):
    """Stand-in for the frozen ConvNeXt-Large stages (odd features[] outputs).

    x: [B, 3, H, W] NCHW.  Returns 4 NCHW feature maps at strides 4/8/16/32.
    """
    # TODO(synk): real ConvNeXt-Large backbone replaced with a deterministic stand-in.
    feats = []
    B, C, H, W = x.shape
    for i, dim in enumerate(CONV_DIMS):
        s = max(H // (4 * (2 ** i)), 1)
        k = H // s
        pooled = x.reshape(B, C, s, k, s, k).mean(axis=(3, 5))          # [B, 3, s, s]
        f = jnp.einsum("bchw,cd->bdhw", pooled, p["conv_w"][i]) \
            + p["conv_b"][i][None, :, None, None]
        feats.append(f)
    return feats


def vision_tower_forward(p, images_vit, conv_feats, cvfm_params):
    """Stand-in for the frozen CLIP ViT with CVFM hooks after interaction layers."""
    # TODO(synk): real frozen CLIP ViT replaced with a deterministic stand-in.
    B, C, H, W = images_vit.shape
    ph, pw = H // PATCH, W // PATCH
    patches = images_vit.reshape(B, C, ph, PATCH, pw, PATCH) \
                        .transpose(0, 2, 4, 1, 3, 5) \
                        .reshape(B, ph * pw, C * PATCH * PATCH)
    tok = patches @ p["embed_w"] + p["embed_b"]                         # [B, hw, D]
    cls = jnp.broadcast_to(p["cls"], (B, 1, VIT_DIM))
    x = jnp.concatenate([cls, tok], axis=1) + p["pos"]                  # [B, N, D]

    for layer_i in range(NUM_LAYERS):
        # frozen "ViT block" stand-in (glue)
        x = x + jnp.tanh(x @ p["layer_w"][layer_i])
        if (layer_i + 1) in INTERACTION_IDX:
            i = INTERACTION_IDX.index(layer_i + 1)
            x = cvfm_apply(x, conv_feats[i], cvfm_params[i])            # Pallas kernel
    return x


def hybrid_encoder_forward(params, images_vit, images_convnext):
    conv_feats = convnext_stages(params["convnext"], images_convnext)
    img_feats = vision_tower_forward(params["vit"], images_vit, conv_feats,
                                     params["cvfm"])
    return img_feats


# ----------------------------- deterministic params ------------------------------
def init_params(key):
    keys = iter(jax.random.split(key, 64))
    nrm = lambda shape, s=0.02: (s * jax.random.normal(next(keys), shape)).astype(jnp.float32)

    vit = {
        "embed_w": nrm((3 * PATCH * PATCH, VIT_DIM)),
        "embed_b": nrm((VIT_DIM,)),
        "cls": nrm((1, 1, VIT_DIM)),
        "pos": nrm((1, 1 + (16 // PATCH) ** 2, VIT_DIM)),
        "layer_w": nrm((NUM_LAYERS, VIT_DIM, VIT_DIM)),
    }
    convnext = {
        "conv_w": [nrm((3, d)) for d in CONV_DIMS],
        "conv_b": [nrm((d,)) for d in CONV_DIMS],
    }
    cvfm = []
    for d in CONV_DIMS:
        cvfm.append({
            "w1": nrm((VIT_DIM + d, 4 * VIT_DIM)),
            "b1": nrm((4 * VIT_DIM,)),
            "w2": nrm((4 * VIT_DIM, VIT_DIM)),
            "b2": nrm((VIT_DIM,)),
            # nn.Parameter(torch.zeros(1)) in the reference; non-zero here so the
            # MLP path is actually exercised (deterministic).
            "gate": jnp.asarray([0.5], dtype=jnp.float32),
            "ln_g": jnp.ones((VIT_DIM,), jnp.float32),
            "ln_b": jnp.zeros((VIT_DIM,), jnp.float32),
        })
    return {"vit": vit, "convnext": convnext, "cvfm": cvfm}


# ----------------------------------- main ----------------------------------------
if __name__ == "__main__":
    key = jax.random.PRNGKey(0)
    k_img1, k_img2, k_par = jax.random.split(key, 3)

    B = 2
    images_vit = jax.random.normal(k_img1, (B, 3, 16, 16), dtype=jnp.float32)       # NCHW
    images_convnext = jax.random.normal(k_img2, (B, 3, 32, 32), dtype=jnp.float32)  # NCHW

    params = init_params(k_par)

    out = jax.jit(hybrid_encoder_forward)(params, images_vit, images_convnext)
    out = jax.block_until_ready(out)

    assert out.shape == (B, 1 + (16 // PATCH) ** 2, VIT_DIM)
    assert bool(jnp.all(jnp.isfinite(out)))
    print("KERNEL_OK")
</pallas_src>

<mosaic_0001>
module attributes {stable_mosaic.version = 11 : i64} {
  func.func @kernel(%arg0: i32, %arg1: i32, %arg2: memref<1x1xf32, #tpu.memory_space<smem>>, %arg3: memref<40x128xf32, #tpu.memory_space<vmem>>, %arg4: memref<40x128xbf16, #tpu.memory_space<vmem>>, %arg5: memref<128x128xbf16, #tpu.memory_space<vmem>>, %arg6: memref<128x128xbf16, #tpu.memory_space<vmem>>, %arg7: memref<1x128xf32, #tpu.memory_space<vmem>>, %arg8: memref<128x128xbf16, #tpu.memory_space<vmem>>, %arg9: memref<1x128xf32, #tpu.memory_space<vmem>>, %arg10: memref<1x128xf32, #tpu.memory_space<vmem>>, %arg11: memref<1x128xf32, #tpu.memory_space<vmem>>, %arg12: memref<40x128xf32, #tpu.memory_space<vmem>>, %arg13: memref<40x128xf32, #tpu.memory_space<vmem>>) attributes {dimension_semantics = [#tpu.dimension_semantics<parallel>, #tpu.dimension_semantics<arbitrary>], iteration_bounds = array<i64: 1, 1>, scalar_prefetch = 0 : i64, scratch_operands = 1 : i64, tpu.core_type = #tpu.core_type<tc>, window_params = [{transform_indices = @transform_0, window_bounds = array<i64: 1, 1>}, {transform_indices = @transform_1, window_bounds = array<i64: 40, 128>}, {transform_indices = @transform_2, window_bounds = array<i64: 40, 128>}, {transform_indices = @transform_3, window_bounds = array<i64: 128, 128>}, {transform_indices = @transform_4, window_bounds = array<i64: 128, 128>}, {transform_indices = @transform_5, window_bounds = array<i64: 1, 128>}, {transform_indices = @transform_6, window_bounds = array<i64: 128, 128>}, {pipeline_mode = #tpu.pipeline_mode<synchronous>, transform_indices = @transform_7, window_bounds = array<i64: 1, 128>}, {pipeline_mode = #tpu.pipeline_mode<synchronous>, transform_indices = @transform_8, window_bounds = array<i64: 1, 128>}, {pipeline_mode = #tpu.pipeline_mode<synchronous>, transform_indices = @transform_9, window_bounds = array<i64: 1, 128>}, {transform_indices = @transform_10, window_bounds = array<i64: 40, 128>}]} {
    %c0_i32 = arith.constant 0 : i32
    %0 = arith.cmpi eq, %arg1, %c0_i32 : i32
    %1 = arith.extui %0 : i1 to i32
    %c0_i32_0 = arith.constant 0 : i32
    %2 = arith.cmpi ne, %1, %c0_i32_0 : i32
    scf.if %2 {
      %cst_23 = arith.constant 0.000000e+00 : f32
      %31 = vector.broadcast %cst_23 : f32 to vector<40x128xf32>
      %c0_24 = arith.constant 0 : index
      %c0_25 = arith.constant 0 : index
      %32 = vector.load %arg13[%c0_24, %c0_25] : memref<40x128xf32, #tpu.memory_space<vmem>>, vector<40x128xf32>
      tpu.vector_store %arg13[%c0_24, %c0_25], %31 {strides = array<i32>} : memref<40x128xf32, #tpu.memory_space<vmem>>, vector<40x128xf32>,
    } else {
    }
    %c0 = arith.constant 0 : index
    %c0_1 = arith.constant 0 : index
    %3 = vector.load %arg3[%c0, %c0_1] : memref<40x128xf32, #tpu.memory_space<vmem>>, vector<40x128xf32>
    %4 = arith.truncf %3 : vector<40x128xf32> to vector<40x128xbf16>
    %c0_2 = arith.constant 0 : index
    %c0_3 = arith.constant 0 : index
    %5 = vector.load %arg5[%c0_2, %c0_3] : memref<128x128xbf16, #tpu.memory_space<vmem>>, vector<128x128xbf16>
    %cst = arith.constant dense<0.000000e+00> : vector<40x128xf32>
    %6 = tpu.matmul %4, %5, %cst {dimension_numbers = #tpu.dot_dimension_numbers<[1], [0], [0], [1], [0, 0, 1, 1], [], []>} : vector<40x128xbf16>, vector<128x128xbf16>, vector<40x128xf32> -> vector<40x128xf32>
    %c0_4 = arith.constant 0 : index
    %c0_5 = arith.constant 0 : index
    %7 = vector.load %arg4[%c0_4, %c0_5] : memref<40x128xbf16, #tpu.memory_space<vmem>>, vector<40x128xbf16>
    %c0_6 = arith.constant 0 : index
    %c0_7 = arith.constant 0 : index
    %8 = vector.load %arg6[%c0_6, %c0_7] : memref<128x128xbf16, #tpu.memory_space<vmem>>, vector<128x128xbf16>
    %cst_8 = arith.constant dense<0.000000e+00> : vector<40x128xf32>
    %9 = tpu.matmul %7, %8, %cst_8 {dimension_numbers = #tpu.dot_dimension_numbers<[1], [0], [0], [1], [0, 0, 1, 1], [], []>} : vector<40x128xbf16>, vector<128x128xbf16>, vector<40x128xf32> -> vector<40x128xf32>
    %10 = arith.addf %6, %9 : vector<40x128xf32>
    %c0_9 = arith.constant 0 : index
    %c0_10 = arith.constant 0 : index
    %11 = vector.load %arg7[%c0_9, %c0_10] : memref<1x128xf32, #tpu.memory_space<vmem>>, vector<1x128xf32>
    %12 = vector.broadcast %11 : vector<1x128xf32> to vector<40x128xf32>
    %13 = arith.addf %10, %12 : vector<40x128xf32>
    %cst_11 = arith.constant 5.000000e-01 : f32
    %14 = vector.broadcast %cst_11 : f32 to vector<40x128xf32>
    %15 = arith.mulf %14, %13 : vector<40x128xf32>
    %cst_12 = arith.constant 0.707106769 : f32
    %16 = vector.broadcast %cst_12 : f32 to vector<40x128xf32>
    %17 = arith.mulf %13, %16 : vector<40x128xf32>
    %18 = math.erf %17 : vector<40x128xf32>
    %cst_13 = arith.constant 1.000000e+00 : f32
    %19 = vector.broadcast %cst_13 : f32 to vector<40x128xf32>
    %20 = arith.addf %19, %18 : vector<40x128xf32>
    %21 = arith.mulf %15, %20 : vector<40x128xf32>
    %c0_14 = arith.constant 0 : index
    %c0_15 = arith.constant 0 : index
    %22 = vector.load %arg13[%c0_14, %c0_15] : memref<40x128xf32, #tpu.memory_space<vmem>>, vector<40x128xf32>
    %23 = arith.truncf %21 : vector<40x128xf32> to vector<40x128xbf16>
    %c0_16 = arith.constant 0 : index
    %c0_17 = arith.constant 0 : index
    %24 = vector.load %arg8[%c0_16, %c0_17] : memref<128x128xbf16, #tpu.memory_space<vmem>>, vector<128x128xbf16>
    %cst_18 = arith.constant dense<0.000000e+00> : vector<40x128xf32>
    %25 = tpu.matmul %23, %24, %cst_18 {dimension_numbers = #tpu.dot_dimension_numbers<[1], [0], [0], [1], [0, 0, 1, 1], [], []>} : vector<40x128xbf16>, vector<128x128xbf16>, vector<40x128xf32> -> vector<40x128xf32>
    %26 = arith.addf %22, %25 : vector<40x128xf32>
    %c0_19 = arith.constant 0 : index
    %c0_20 = arith.constant 0 : index
    %27 = vector.load %arg13[%c0_19, %c0_20] : memref<40x128xf32, #tpu.memory_space<vmem>>, vector<40x128xf32>
    tpu.vector_store %arg13[%c0_19, %c0_20], %26 {strides = array<i32>} : memref<40x128xf32, #tpu.memory_space<vmem>>, vector<40x128xf32>,
    %c0_i32_21 = arith.constant 0 : i32
    %28 = arith.cmpi eq, %arg1, %c0_i32_21 : i32
    %29 = arith.extui %28 : i1 to i32
    %c0_i32_22 = arith.constant 0 : i32
    %30 = arith.cmpi ne, %29, %c0_i32_22 : i32
    scf.if %30 {
      %c0_23 = arith.constant 0 : index
      %c0_24 = arith.constant 0 : index
      %31 = memref.load %arg2[%c0_23, %c0_24] : memref<1x1xf32, #tpu.memory_space<smem>>
      %c0_25 = arith.constant 0 : index
      %c0_26 = arith.constant 0 : index
      %32 = vector.load %arg13[%c0_25, %c0_26] : memref<40x128xf32, #tpu.memory_space<vmem>>, vector<40x128xf32>
      %c0_27 = arith.constant 0 : index
      %c0_28 = arith.constant 0 : index
      %33 = vector.load %arg9[%c0_27, %c0_28] : memref<1x128xf32, #tpu.memory_space<vmem>>, vector<1x128xf32>
      %34 = vector.broadcast %33 : vector<1x128xf32> to vector<40x128xf32>
      %35 = arith.addf %32, %34 : vector<40x128xf32>
      %36 = vector.broadcast %31 : f32 to vector<40x128xf32>
      %37 = arith.mulf %36, %35 : vector<40x128xf32>
      %38 = arith.addf %3, %37 : vector<40x128xf32>
      %39 = tpu.iota {dimensions = array<i32: 1>} : vector<40x128xi32>
      %c32_i32 = arith.constant 32 : i32
      %40 = vector.broadcast %c32_i32 : i32 to vector<40x128xi32>
      %41 = arith.cmpi slt, %39, %40 : vector<40x128xi32>
      %cst_29 = arith.constant 0.000000e+00 : f32
      %42 = vector.broadcast %cst_29 : f32 to vector<40x128xf32>
      %43 = arith.select %41, %38, %42 : vector<40x128xi1>, vector<40x128xf32>
      %cst_30 = arith.constant dense<0.000000e+00> : vector<40xf32>
      %44 = vector.multi_reduction <add>, %43, %cst_30 [1] : vector<40x128xf32> to vector<40xf32>
      %45 = vector.shape_cast %44 : vector<40xf32> to vector<40x1xf32>
      %cst_31 = arith.constant 3.125000e-02 : f32
      %46 = vector.broadcast %cst_31 : f32 to vector<40x1xf32>
      %47 = arith.mulf %45, %46 : vector<40x1xf32>
      %48 = vector.broadcast %47 : vector<40x1xf32> to vector<40x128xf32>
      %49 = arith.subf %38, %48 : vector<40x128xf32>
      %cst_32 = arith.constant 0.000000e+00 : f32
      %50 = vector.broadcast %cst_32 : f32 to vector<40x128xf32>
      %51 = arith.select %41, %49, %50 : vector<40x128xi1>, vector<40x128xf32>
      %52 = arith.mulf %51, %51 : vector<40x128xf32>
      %cst_33 = arith.constant dense<0.000000e+00> : vector<40xf32>
      %53 = vector.multi_reduction <add>, %52, %cst_33 [1] : vector<40x128xf32> to vector<40xf32>
      %54 = vector.shape_cast %53 : vector<40xf32> to vector<40x1xf32>
      %cst_34 = arith.constant 3.125000e-02 : f32
      %55 = vector.broadcast %cst_34 : f32 to vector<40x1xf32>
      %56 = arith.mulf %54, %55 : vector<40x1xf32>
      %cst_35 = arith.constant 9.99999974E-6 : f32
      %57 = vector.broadcast %cst_35 : f32 to vector<40x1xf32>
      %58 = arith.addf %56, %57 : vector<40x1xf32>
      %59 = math.rsqrt %58 : vector<40x1xf32>
      %60 = vector.broadcast %59 : vector<40x1xf32> to vector<40x128xf32>
      %61 = arith.mulf %51, %60 : vector<40x128xf32>
      %c0_36 = arith.constant 0 : index
      %c0_37 = arith.constant 0 : index
      %62 = vector.load %arg10[%c0_36, %c0_37] : memref<1x128xf32, #tpu.memory_space<vmem>>, vector<1x128xf32>
      %63 = vector.broadcast %62 : vector<1x128xf32> to vector<40x128xf32>
      %64 = arith.mulf %61, %63 : vector<40x128xf32>
      %c0_38 = arith.constant 0 : index
      %c0_39 = arith.constant 0 : index
      %65 = vector.load %arg11[%c0_38, %c0_39] : memref<1x128xf32, #tpu.memory_space<vmem>>, vector<1x128xf32>
      %66 = vector.broadcast %65 : vector<1x128xf32> to vector<40x128xf32>
      %67 = arith.addf %64, %66 : vector<40x128xf32>
      %c0_40 = arith.constant 0 : index
      %c0_41 = arith.constant 0 : index
      %68 = vector.load %arg12[%c0_40, %c0_41] : memref<40x128xf32, #tpu.memory_space<vmem>>, vector<40x128xf32>
      tpu.vector_store %arg12[%c0_40, %c0_41], %67 {strides = array<i32>} : memref<40x128xf32, #tpu.memory_space<vmem>>, vector<40x128xf32>,
    } else {
    }
    return
  }
  func.func @transform_0(%arg0: i32, %arg1: i32) -> (i32, i32) {
    %c0_i32 = arith.constant 0 : i32
    %c0_i32_0 = arith.constant 0 : i32
    %c0_i32_1 = arith.constant 0 : i32
    return %c0_i32, %c0_i32_0 : i32, i32
  }
  func.func @transform_1(%arg0: i32, %arg1: i32) -> (i32, i32) {
    %c0_i32 = arith.constant 0 : i32
    %c0_i32_0 = arith.constant 0 : i32
    return %arg0, %c0_i32 : i32, i32
  }
  func.func @transform_2(%arg0: i32, %arg1: i32) -> (i32, i32) {
    %c0_i32 = arith.constant 0 : i32
    %c0_i32_0 = arith.constant 0 : i32
    return %arg0, %c0_i32 : i32, i32
  }
  func.func @transform_3(%arg0: i32, %arg1: i32) -> (i32, i32) {
    %c0_i32 = arith.constant 0 : i32
    %c0_i32_0 = arith.constant 0 : i32
    return %c0_i32, %arg1 : i32, i32
  }
  func.func @transform_4(%arg0: i32, %arg1: i32) -> (i32, i32) {
    %c0_i32 = arith.constant 0 : i32
    %c0_i32_0 = arith.constant 0 : i32
    return %c0_i32, %arg1 : i32, i32
  }
  func.func @transform_5(%arg0: i32, %arg1: i32) -> (i32, i32) {
    %c0_i32 = arith.constant 0 : i32
    %c0_i32_0 = arith.constant 0 : i32
    return %c0_i32, %arg1 : i32, i32
  }
  func.func @transform_6(%arg0: i32, %arg1: i32) -> (i32, i32) {
    %c0_i32 = arith.constant 0 : i32
    %c0_i32_0 = arith.constant 0 : i32
    return %arg1, %c0_i32 : i32, i32
  }
  func.func @transform_7(%arg0: i32, %arg1: i32) -> (i32, i32) {
    %c0_i32 = arith.constant 0 : i32
    %c0_i32_0 = arith.constant 0 : i32
    %c0_i32_1 = arith.constant 0 : i32
    return %c0_i32, %c0_i32_0 : i32, i32
  }
  func.func @transform_8(%arg0: i32, %arg1: i32) -> (i32, i32) {
    %c0_i32 = arith.constant 0 : i32
    %c0_i32_0 = arith.constant 0 : i32
    %c0_i32_1 = arith.constant 0 : i32
    return %c0_i32, %c0_i32_0 : i32, i32
  }
  func.func @transform_9(%arg0: i32, %arg1: i32) -> (i32, i32) {
    %c0_i32 = arith.constant 0 : i32
    %c0_i32_0 = arith.constant 0 : i32
    %c0_i32_1 = arith.constant 0 : i32
    return %c0_i32, %c0_i32_0 : i32, i32
  }
  func.func @transform_10(%arg0: i32, %arg1: i32) -> (i32, i32) {
    %c0_i32 = arith.constant 0 : i32
    %c0_i32_0 = arith.constant 0 : i32
    return %arg0, %c0_i32 : i32, i32
  }
}

</mosaic_0001>

<bundles_post_ra>
// kernel: hybrid_encoder_forward.4
= control target key start
LH: loop header
LB: loop body
LE: loop exit
PB: predicated region body
PF: predicated region fallthrough
CT: control target
= control target key end

     0   :  { %16 = vsyncpa [#allocation5], 0  ;;  %s1520_s0 = inlined_call_operand.<no memory space> [shape: f32[1,1], index: 0, kind: input, shape index: {}]   ;;  %s1521_s1 = inlined_call_operand.hbm [shape: f32[40,128], index: 1, kind: input, shape index: {}]   ;;  %s1522_s2 = inlined_call_operand.hbm [shape: bf16[40,128], index: 2, kind: input, shape index: {}]   ;;  %s1523_s3 = inlined_call_operand.hbm [shape: bf16[128,128], index: 3, kind: input, shape index: {}]   ;;  %s1524_s4 = inlined_call_operand.hbm [shape: bf16[128,128], index: 4, kind: input, shape index: {}]   ;;  %s1525_s5 = inlined_call_operand.hbm [shape: f32[1,128], index: 5, kind: input, shape index: {}]   ;;  %s1526_s6 = inlined_call_operand.hbm [shape: bf16[128,128], index: 6, kind: input, shape index: {}]   ;;  %s1527_s7 = inlined_call_operand.hbm [shape: f32[1,128], index: 7, kind: input, shape index: {}]   ;;  %s1528_s8 = inlined_call_operand.hbm [shape: f32[1,128], index: 8, kind: input, shape index: {}]   ;;  %s1529_s9 = inlined_call_operand.hbm [shape: f32[1,128], index: 9, kind: input, shape index: {}]   ;;  %s1530_s10 = inlined_call_operand.hbm [shape: f32[40,128], index: 10, kind: output, shape index: {}]  }
   0x1   :  { %17 = vsyncpa [#allocation8], 0 }
   0x2   :  { %18 = vsyncpa [#allocation11], 0 }
   0x3   :  { %19 = vsyncpa [#allocation14], 0 }
   0x4   :  { %20 = vsyncpa [#allocation17], 0 }
   0x5   :  { %21 = vsyncpa [#allocation6], 0  ;;  %s1214_s13 = smov [#allocation7]   ;;  %s982_s17 = scalar_lea.hbm %s1522_s2, 320 }
   0x6   :  { %s41_s14 = sshll.u32 %s1214_s13, 4  ;;  %p983_p0 = scmp.ne.s32.totalorder %s1522_s2, %s982_s17  ;;  %s42_s14 = int_to_ptr.vmem [resolvable:$true] %s41_s14 }
   0x7   :  { %p986_p1 = scmp.lt.u32.totalorder %s982_s17, %s1522_s2 }
   0x9   :  { %p988_p2 = pnand %p986_p1, %p983_p0 }
   0xb   :  { %991 = shalt.err (!%p988_p2)
}
   0xc   :  { %s992_s22 = scalar_lea.vmem %s42_s14, 320  ;;  %p997_p4 = scmp.lt.s32.totalorder %s42_s14, %s42_s14 }
   0xd   :  { %p993_p3 = scmp.ne.s32.totalorder %s42_s14, %s992_s22  ;;  %p998_p5 = scmp.lt.s32.totalorder %s992_s22, %s992_s22 }
   0xf   :  { %p999_p6 = por %p998_p5, %p997_p4 }
  0x11   :  { %p1000_p7 = pnand %p999_p6, %p993_p3 }
  0x13   :  { %1003 = shalt.err (!%p1000_p7)
}
  0x14   :  { %s1215_s23 = smov 64   ;;  %s1216_s24 = smov 4  }
  0x15   :  { %47 = dma.hbm_to_vmem [thread:$0]  %s1522_s2, 320, %s42_s14, [#allocation8], %s1215_s23, %s1215_s23, %s1216_s24  }
  0x16   :  { %s1217_s27 = smov [#allocation10]   ;;  %s1218_s29 = smov [#allocation13]  }
  0x17   :  { %s65_s28 = sshll.u32 %s1217_s27, 4  ;;  %s87_s30 = sshll.u32 %s1218_s29, 4  ;;  %s66_s28 = int_to_ptr.vmem [resolvable:$true] %s65_s28  ;;  %s88_s30 = int_to_ptr.vmem [resolvable:$true] %s87_s30 }
  0x18   :  { %s1004_s13 = scalar_lea.hbm %s1524_s4, 1024 }
  0x19   :  { %p1005_p8 = scmp.ne.s32.totalorder %s1524_s4, %s1004_s13  ;;  %p1008_p9 = scmp.lt.u32.totalorder %s1004_s13, %s1524_s4 }
  0x1b   :  { %p1010_p10 = pnand %p1008_p9, %p1005_p8 }
  0x1d   :  { %1013 = shalt.err (!%p1010_p10)
}
  0x1e   :  { %s1014_s2 = scalar_lea.vmem %s66_s28, 1024  ;;  %p1019_p12 = scmp.lt.s32.totalorder %s66_s28, %s66_s28 }
  0x1f   :  { %p1015_p11 = scmp.ne.s32.totalorder %s66_s28, %s1014_s2  ;;  %p1020_p13 = scmp.lt.s32.totalorder %s1014_s2, %s1014_s2 }
  0x21   :  { %p1021_p0 = por %p1020_p13, %p1019_p12 }
  0x23   :  { %p1022_p1 = pnand %p1021_p0, %p1015_p11 }
  0x25   :  { %1025 = shalt.err (!%p1022_p1)
}
  0x26   :  { %71 = dma.hbm_to_vmem [thread:$0]  %s1524_s4, 1024, %s66_s28, [#allocation11], %s1215_s23, %s1215_s23, %s1216_s24  }
  0x27   :  { %s1026_s22 = scalar_lea.hbm %s1526_s6, 1024 }
  0x28   :  { %p1027_p2 = scmp.ne.s32.totalorder %s1526_s6, %s1026_s22  ;;  %p1030_p3 = scmp.lt.u32.totalorder %s1026_s22, %s1526_s6 }
  0x2a   :  { %p1032_p4 = pnand %p1030_p3, %p1027_p2 }
  0x2c   :  { %1035 = shalt.err (!%p1032_p4)
}
  0x2d   :  { %s1036_s11 = scalar_lea.vmem %s88_s30, 1024  ;;  %p1041_p6 = scmp.lt.s32.totalorder %s88_s30, %s88_s30 }
  0x2e   :  { %p1037_p5 = scmp.ne.s32.totalorder %s88_s30, %s1036_s11  ;;  %p1042_p7 = scmp.lt.s32.totalorder %s1036_s11, %s1036_s11 }
  0x30   :  { %p1043_p8 = por %p1042_p7, %p1041_p6 }
  0x32   :  { %p1044_p9 = pnand %p1043_p8, %p1037_p5 }
  0x34   :  { %1047 = shalt.err (!%p1044_p9)
}
  0x35   :  { %93 = dma.hbm_to_vmem [thread:$0]  %s1526_s6, 1024, %s88_s30, [#allocation14], %s1215_s23, %s1215_s23, %s1216_s24  }
  0x36   :  { %s1219_s12 = smov [#allocation16]   ;;  %s1220_s15 = smov [#allocation4]  }
  0x37   :  { %s110_s13 = sshll.u32 %s1219_s12, 4  ;;  %s29_s16 = sshll.u32 %s1220_s15, 4  ;;  %s111_s13 = int_to_ptr.vmem [resolvable:$true] %s110_s13  ;;  %s30_s16 = int_to_ptr.vmem [resolvable:$true] %s29_s16 }
  0x38   :  { %s1048_s2 = scalar_lea.hbm %s1528_s8, 16 }
  0x39   :  { %p1049_p10 = scmp.ne.s32.totalorder %s1528_s8, %s1048_s2  ;;  %p1052_p11 = scmp.lt.u32.totalorder %s1048_s2, %s1528_s8 }
  0x3b   :  { %p1054_p12 = pnand %p1052_p11, %p1049_p10 }
  0x3d   :  { %1057 = shalt.err (!%p1054_p12)
}
  0x3e   :  { %s1058_s6 = scalar_lea.vmem %s111_s13, 16  ;;  %s1062_s30 = scalar_lea.vmem %s111_s13, 32 }
  0x3f   :  { %p1059_p13 = scmp.ne.s32.totalorder %s111_s13, %s1058_s6  ;;  %p1063_p0 = scmp.lt.s32.totalorder %s111_s13, %s111_s13 }
  0x40   :  { %p1064_p1 = scmp.lt.s32.totalorder %s1062_s30, %s1058_s6 }
  0x42   :  { %p1065_p2 = por %p1064_p1, %p1063_p0 }
  0x44   :  { %p1066_p3 = pnand %p1065_p2, %p1059_p13 }
  0x46   :  { %1069 = shalt.err (!%p1066_p3)
}
  0x47   :  { %113 = dma.hbm_to_vmem [thread:$0]  %s1528_s8, 16, %s111_s13, [#allocation17]  }
  0x48   :  { %s1070_s29 = scalar_lea.hbm %s1521_s1, 640 }
  0x49   :  { %p1071_p4 = scmp.ne.s32.totalorder %s1521_s1, %s1070_s29  ;;  %p1074_p5 = scmp.lt.u32.totalorder %s1070_s29, %s1521_s1 }
  0x4b   :  { %p1076_p6 = pnand %p1074_p5, %p1071_p4 }
  0x4d   :  { %1079 = shalt.err (!%p1076_p6)
}
  0x4e   :  { %s1080_s15 = scalar_lea.vmem %s30_s16, 640  ;;  %p1085_p8 = scmp.lt.s32.totalorder %s30_s16, %s30_s16 }
  0x4f   :  { %p1081_p7 = scmp.ne.s32.totalorder %s30_s16, %s1080_s15  ;;  %p1086_p9 = scmp.lt.s32.totalorder %s1080_s15, %s1080_s15 }
  0x51   :  { %p1087_p10 = por %p1086_p9, %p1085_p8 }
  0x53   :  { %p1088_p11 = pnand %p1087_p10, %p1081_p7 }
  0x55   :  { %1091 = shalt.err (!%p1088_p11)
}
  0x56   :  { %s1221_s8 = smov 128   ;;  %s1222_s13 = smov 8  }
  0x57   :  { %35 = dma.hbm_to_vmem [thread:$0]  %s1521_s1, 640, %s30_s16, [#allocation5], %s1221_s8, %s1221_s8, %s1222_s13  }
  0x58   :  { %s1223_s2 = smov [#allocation9]   ;;  %s1224_s19 = smov [#allocation12]  }
  0x59   :  { %s53_s14 = sshll.u32 %s1223_s2, 4  ;;  %s78_s20 = sshll.u32 %s1224_s19, 4  ;;  %s54_s14 = int_to_ptr.vmem [resolvable:$true] %s53_s14  ;;  %s79_s20 = int_to_ptr.vmem [resolvable:$true] %s78_s20 }
  0x5a   :  { %s1092_s30 = scalar_lea.hbm %s1523_s3, 1024 }
  0x5b   :  { %p1093_p12 = scmp.ne.s32.totalorder %s1523_s3, %s1092_s30  ;;  %p1096_p13 = scmp.lt.u32.totalorder %s1092_s30, %s1523_s3 }
  0x5d   :  { %p1098_p0 = pnand %p1096_p13, %p1093_p12 }
  0x5f   :  { %1101 = shalt.err (!%p1098_p0)
}
  0x60   :  { %s1102_s1 = scalar_lea.vmem %s54_s14, 1024  ;;  %p1107_p2 = scmp.lt.s32.totalorder %s54_s14, %s54_s14 }
  0x61   :  { %p1103_p1 = scmp.ne.s32.totalorder %s54_s14, %s1102_s1  ;;  %p1108_p3 = scmp.lt.s32.totalorder %s1102_s1, %s1102_s1 }
  0x63   :  { %p1109_p4 = por %p1108_p3, %p1107_p2 }
  0x65   :  { %p1110_p5 = pnand %p1109_p4, %p1103_p1 }
  0x67   :  { %1113 = shalt.err (!%p1110_p5)
}
  0x68   :  { %59 = dma.hbm_to_vmem [thread:$0]  %s1523_s3, 1024, %s54_s14, [#allocation8], %s1215_s23, %s1215_s23, %s1216_s24  }
  0x69   :  { %s1114_s28 = scalar_lea.hbm %s1525_s5, 16 }
  0x6a   :  { %p1115_p6 = scmp.ne.s32.totalorder %s1525_s5, %s1114_s28  ;;  %p1118_p7 = scmp.lt.u32.totalorder %s1114_s28, %s1525_s5 }
  0x6c   :  { %p1120_p8 = pnand %p1118_p7, %p1115_p6 }
  0x6e   :  { %1123 = shalt.err (!%p1120_p8)
}
  0x6f   :  { %s1124_s2 = scalar_lea.vmem %s79_s20, 16  ;;  %s1128_s19 = scalar_lea.vmem %s79_s20, 32 }
  0x70   :  { %p1125_p9 = scmp.ne.s32.totalorder %s79_s20, %s1124_s2  ;;  %p1129_p10 = scmp.lt.s32.totalorder %s79_s20, %s79_s20 }
  0x71   :  { %p1130_p11 = scmp.lt.s32.totalorder %s1128_s19, %s1124_s2 }
  0x73   :  { %p1131_p12 = por %p1130_p11, %p1129_p10 }
  0x75   :  { %p1132_p13 = pnand %p1131_p12, %p1125_p9 }
  0x77   :  { %1135 = shalt.err (!%p1132_p13)
}
  0x78   :  { %81 = dma.hbm_to_vmem [thread:$0]  %s1525_s5, 16, %s79_s20, [#allocation11]  }
  0x79   :  { %s1225_s24 = smov [#allocation15]   ;;  %s1226_s21 = smov [#allocation18]  }
  0x7a   :  { %s100_s14 = sshll.u32 %s1225_s24, 4  ;;  %s120_s6 = sshll.u32 %s1226_s21, 4  ;;  %s101_s14 = int_to_ptr.vmem [resolvable:$true] %s100_s14  ;;  %s121_s6 = int_to_ptr.vmem [resolvable:$true] %s120_s6 }
  0x7b   :  { %s1136_s25 = scalar_lea.hbm %s1527_s7, 16 }
  0x7c   :  { %p1137_p0 = scmp.ne.s32.totalorder %s1527_s7, %s1136_s25  ;;  %p1140_p1 = scmp.lt.u32.totalorder %s1136_s25, %s1527_s7 }
  0x7e   :  { %p1142_p2 = pnand %p1140_p1, %p1137_p0 }
  0x80   :  { %1145 = shalt.err (!%p1142_p2)
}
  0x81   :  { %s1146_s5 = scalar_lea.vmem %s101_s14, 16  ;;  %s1150_s20 = scalar_lea.vmem %s101_s14, 32 }
  0x82   :  { %p1147_p3 = scmp.ne.s32.totalorder %s101_s14, %s1146_s5  ;;  %p1151_p4 = scmp.lt.s32.totalorder %s101_s14, %s101_s14 }
  0x83   :  { %p1152_p5 = scmp.lt.s32.totalorder %s1150_s20, %s1146_s5 }
  0x85   :  { %p1153_p6 = por %p1152_p5, %p1151_p4 }
  0x87   :  { %p1154_p7 = pnand %p1153_p6, %p1147_p3 }
  0x89   :  { %1157 = shalt.err (!%p1154_p7)
}
  0x8a   :  { %103 = dma.hbm_to_vmem [thread:$0]  %s1527_s7, 16, %s101_s14, [#allocation14]  }
  0x8b   :  { %s1158_s12 = scalar_lea.hbm %s1529_s9, 16 }
  0x8c   :  { %p1159_p8 = scmp.ne.s32.totalorder %s1529_s9, %s1158_s12  ;;  %p1162_p9 = scmp.lt.u32.totalorder %s1158_s12, %s1529_s9 }
  0x8e   :  { %p1164_p10 = pnand %p1162_p9, %p1159_p8 }
  0x90   :  { %1167 = shalt.err (!%p1164_p10)
}
  0x91   :  { %s1168_s19 = scalar_lea.vmem %s121_s6, 16  ;;  %s1172_s3 = scalar_lea.vmem %s121_s6, 32 }
  0x92   :  { %p1169_p11 = scmp.ne.s32.totalorder %s121_s6, %s1168_s19  ;;  %p1173_p12 = scmp.lt.s32.totalorder %s121_s6, %s121_s6 }
  0x93   :  { %p1174_p13 = scmp.lt.s32.totalorder %s1172_s3, %s1168_s19 }
  0x95   :  { %p1175_p0 = por %p1174_p13, %p1173_p12 }
  0x97   :  { %p1176_p1 = pnand %p1175_p0, %p1169_p11 }
  0x99   :  { %1179 = shalt.err (!%p1176_p1)
}
  0x9a   :  { %123 = dma.hbm_to_vmem [thread:$0]  %s1529_s9, 16, %s121_s6, [#allocation17]  }
  0x9b   :  { %1202 = dma.done.wait [#allocation5], 640  }
  0x9c   :  { %1203 = vsyncadd [#allocation5], 4294966656 }
  0x9d   :  { %1204 = dma.done.wait [#allocation8], 1344  }
  0x9e   :  { %1205 = vsyncadd [#allocation8], 4294965952 }
  0x9f   :  { %1206 = dma.done.wait [#allocation11], 1040  }
  0xa0   :  { %1207 = vsyncadd [#allocation11], 4294966256 }
  0xa1   :  { %1208 = dma.done.wait [#allocation14], 1040  }
  0xa2   :  { %1209 = vsyncadd [#allocation14], 4294966256 }
  0xa3   :  { %1210 = dma.done.wait [#allocation17], 32  }
  0xa4   :  { %1211 = vsyncadd [#allocation17], 4294967264  ;;  %v1227_v0 = vmov 0.0   ;;  %vm1228_vm0 = vmmov 0   ;;  %v935_v1 = vld [vmem:[#allocation10] sm:$0xff]   ;;  %v937_v3 = vld [vmem:[#allocation10 + $0x8] sm:$0xff]  }
  0xa5   :  { %819 = vmatprep.subr.bf16.mxu0 %v1227_v0  ;;  %847 = vmatprep.subr.bf16.mxu1 %v1227_v0  ;;  %v936_v2 = vld [vmem:[#allocation9] sm:$0xff]   ;;  %v938_v4 = vld [vmem:[#allocation9 + $0x8] sm:$0xff]   ;;  %v939_v5 = vld [vmem:[#allocation10 + $0x10] sm:$0xff]  }
  0xa6   :  { %835 = vmatprep.mubr.msk.bf16.mxu0 %vm1228_vm0, %v1227_v0  ;;  %863 = vmatprep.mubr.msk.bf16.mxu1 %vm1228_vm0, %v1227_v0  ;;  %v940_v6 = vld [vmem:[#allocation9 + $0x10] sm:$0xff]   ;;  %v941_v7 = vld [vmem:[#allocation10 + $0x18] sm:$0xff]   ;;  %v943_v9 = vld [vmem:[#allocation10 + $0x20] sm:$0xff]  }
  0xa7   :  { %820 = vmatpush3.bf16.msra.mxu0 %v935_v1  ;;  %848 = vmatpush3.bf16.msra.mxu1 %v936_v2  ;;  %v942_v8 = vld [vmem:[#allocation9 + $0x18] sm:$0xff]   ;;  %v944_v10 = vld [vmem:[#allocation9 + $0x20] sm:$0xff]   ;;  %v945_v11 = vld [vmem:[#allocation10 + $0x28] sm:$0xff]  }
  0xa8   :  { %821 = vmatprep.subr.bf16.mxu0 %v1227_v0  ;;  %849 = vmatprep.subr.bf16.mxu1 %v1227_v0  ;;  %v946_v12 = vld [vmem:[#allocation9 + $0x28] sm:$0xff]   ;;  %v947_v13 = vld [vmem:[#allocation10 + $0x30] sm:$0xff]   ;;  %v949_v15 = vld [vmem:[#allocation10 + $0x38] sm:$0xff]  }
  0xa9   :  { %v948_v14 = vld [vmem:[#allocation9 + $0x30] sm:$0xff]   ;;  %v950_v16 = vld [vmem:[#allocation9 + $0x38] sm:$0xff]   ;;  %v1427_v17 = vld [vmem:[#allocation4] sm:$0xff] }
  0xaa   :  { %v1429_v18 = vld [vmem:[#allocation4 + $0x8] sm:$0xff]  ;;  %v954_v21 = vld [vmem:[#allocation13] sm:$0xff]   ;;  %v1440_v22 = vld [vmem:[#allocation4 + $0x10] sm:$0xff] }
  0xab   :  { %822 = vmatpush3.bf16.msra.mxu0 %v937_v3  ;;  %850 = vmatpush3.bf16.msra.mxu1 %v938_v4  ;;  %v951_v19 = vld [vmem:[#allocation7] sm:$0xff]   ;;  %v166_v20 = vpack.c.bf16 %v1429_v18, %v1427_v17  ;;  %v1442_v23 = vld [vmem:[#allocation4 + $0x18] sm:$0xff]  ;;  %v952_v25 = vld [vmem:[#allocation7 + $0x8] sm:$0xff]  }
  0xac   :  { %823 = vmatprep.subr.bf16.mxu0 %v1227_v0  ;;  %851 = vmatprep.subr.bf16.mxu1 %v1227_v0  ;;  %v955_v24 = vld [vmem:[#allocation13 + $0x8] sm:$0xff]   ;;  %v167_v26 = vpack.c.bf16 %v1442_v23, %v1440_v22  ;;  %v953_v28 = vld [vmem:[#allocation7 + $0x10] ss:$0 sps:$4 sm:$0xff]   ;;  %v956_v30 = vld [vmem:[#allocation13 + $0x10] sm:$0xff]  }
  0xad   :  { %v1454_v27 = vld [vmem:[#allocation4 + $0x20] sm:$0xff]  ;;  %v957_v31 = vld [vmem:[#allocation13 + $0x18] sm:$0xff]   ;;  %v960_v34 = vld [vmem:[#allocation13 + $0x30] sm:$0xff]  }
  0xae   :  { %v168_v29 = vpack.c.bf16 %v1454_v27, %v1454_v27  ;;  %v958_v32 = vld [vmem:[#allocation13 + $0x20] sm:$0xff]   ;;  %v959_v33 = vld [vmem:[#allocation13 + $0x28] sm:$0xff]   ;;  %v961_v35 = vld [vmem:[#allocation13 + $0x38] sm:$0xff]  }
  0xaf   :  { %824 = vmatpush3.bf16.msra.mxu0 %v939_v5  ;;  %852 = vmatpush3.bf16.msra.mxu1 %v940_v6  ;;  %v774_v38 = vld [vmem:[#allocation12] ss:$0 sm:$0xff] }
  0xb0   :  { %825 = vmatprep.subr.bf16.mxu0 %v1227_v0  ;;  %853 = vmatprep.subr.bf16.mxu1 %v1227_v0 }
  0xb3   :  { %826 = vmatpush3.bf16.msra.mxu0 %v941_v7  ;;  %854 = vmatpush3.bf16.msra.mxu1 %v942_v8 }
  0xb4   :  { %827 = vmatprep.subr.bf16.mxu0 %v1227_v0  ;;  %855 = vmatprep.subr.bf16.mxu1 %v1227_v0 }
  0xb7   :  { %828 = vmatpush3.bf16.msra.mxu0 %v943_v9  ;;  %856 = vmatpush3.bf16.msra.mxu1 %v944_v10 }
  0xb8   :  { %829 = vmatprep.subr.bf16.mxu0 %v1227_v0  ;;  %857 = vmatprep.subr.bf16.mxu1 %v1227_v0 }
  0xbb   :  { %830 = vmatpush3.bf16.msra.mxu0 %v945_v11  ;;  %858 = vmatpush3.bf16.msra.mxu1 %v946_v12 }
  0xbc   :  { %831 = vmatprep.subr.bf16.mxu0 %v1227_v0  ;;  %859 = vmatprep.subr.bf16.mxu1 %v1227_v0 }
  0xbf   :  { %832 = vmatpush3.bf16.msra.mxu0 %v947_v13  ;;  %860 = vmatpush3.bf16.msra.mxu1 %v948_v14 }
  0xc0   :  { %833 = vmatprep.subr.bf16.mxu0 %v1227_v0  ;;  %861 = vmatprep.subr.bf16.mxu1 %v1227_v0 }
  0xc3   :  { %834 = vmatpush3.bf16.msra.mxu0 %v949_v15  ;;  %862 = vmatpush3.bf16.msra.mxu1 %v950_v16 }
  0xc4   :  { %875 = vmatprep.subr.bf16.mxu0 %v1227_v0  ;;  %903 = vmatprep.subr.bf16.mxu1 %v1227_v0 }
  0xc6   :  { %836 = vmatmul.mubr.bf16.vlgmr.msra.gmra.mrb[0].mxu0 %v951_v19  ;;  %864 = vmatmul.mubr.bf16.vlgmr.msra.gmra.mrb[0].mxu1 %v166_v20 }
  0xc7   :  { %839 = vmatprep.mubr.msk.bf16.mxu0 %vm1228_vm0, %v1227_v0  ;;  %867 = vmatprep.mubr.msk.bf16.mxu1 %vm1228_vm0, %v1227_v0 }
  0xc8   :  { %876 = vmatpush3.bf16.msra.mxu0 %v954_v21  ;;  %911 = vmatpush3.bf16.msra.mxu1 %v954_v21 }
  0xc9   :  { %877 = vmatprep.subr.bf16.mxu0 %v1227_v0  ;;  %904 = vmatprep.subr.bf16.mxu1 %v1227_v0 }
  0xcc   :  { %878 = vmatpush3.bf16.msra.mxu0 %v955_v24  ;;  %912 = vmatpush3.bf16.msra.mxu1 %v955_v24 }
  0xcd   :  { %879 = vmatprep.subr.bf16.mxu0 %v1227_v0  ;;  %905 = vmatprep.subr.bf16.mxu1 %v1227_v0 }
  0xce   :  { %840 = vmatmul.mubr.bf16.gmra.mrb[4].mxu0 %v952_v25  ;;  %868 = vmatmul.mubr.bf16.gmra.mrb[4].mxu1 %v167_v26 }
  0xcf   :  { %843 = vmatprep.mubr.msk.bf16.mxu0 %vm1228_vm0, %v1227_v0  ;;  %871 = vmatprep.mubr.msk.bf16.mxu1 %vm1228_vm0, %v1227_v0 }
  0xd0   :  { %880 = vmatpush3.bf16.msra.mxu0 %v956_v30  ;;  %913 = vmatpush3.bf16.msra.mxu1 %v956_v30 }
  0xd1   :  { %881 = vmatprep.subr.bf16.mxu0 %v1227_v0  ;;  %906 = vmatprep.subr.bf16.mxu1 %v1227_v0 }
  0xd4   :  { %882 = vmatpush3.bf16.msra.mxu0 %v957_v31  ;;  %914 = vmatpush3.bf16.msra.mxu1 %v957_v31 }
  0xd5   :  { %883 = vmatprep.subr.bf16.mxu0 %v1227_v0  ;;  %907 = vmatprep.subr.bf16.mxu1 %v1227_v0 }
  0xd6   :  { %844 = vmatmul.mubr.bf16.gmra.mrb[8].mxu0 %v953_v28  ;;  %872 = vmatmul.mubr.bf16.gmra.mrb[8].mxu1 %v168_v29 }
  0xd7   :  { %891 = vmatprep.mubr.msk.bf16.mxu0 %vm1228_vm0, %v1227_v0  ;;  %895 = vmatprep.mubr.msk.bf16.mxu1 %vm1228_vm0, %v1227_v0 }
  0xd8   :  { %884 = vmatpush3.bf16.msra.mxu0 %v958_v32  ;;  %915 = vmatpush3.bf16.msra.mxu1 %v958_v32 }
  0xd9   :  { %885 = vmatprep.subr.bf16.mxu0 %v1227_v0  ;;  %908 = vmatprep.subr.bf16.mxu1 %v1227_v0 }
  0xdc   :  { %886 = vmatpush3.bf16.msra.mxu0 %v959_v33  ;;  %916 = vmatpush3.bf16.msra.mxu1 %v959_v33 }
  0xdd   :  { %887 = vmatprep.subr.bf16.mxu0 %v1227_v0  ;;  %909 = vmatprep.subr.bf16.mxu1 %v1227_v0 }
  0xe0   :  { %888 = vmatpush3.bf16.msra.mxu0 %v960_v34  ;;  %917 = vmatpush3.bf16.msra.mxu1 %v960_v34 }
  0xe1   :  { %889 = vmatprep.subr.bf16.mxu0 %v1227_v0  ;;  %910 = vmatprep.subr.bf16.mxu1 %v1227_v0 }
  0xe4   :  { %890 = vmatpush3.bf16.msra.mxu0 %v961_v35  ;;  %918 = vmatpush3.bf16.msra.mxu1 %v961_v35 }
 0x199   :  { %v304_v36 = vpop.f32.mrb[0].mxu0  ;;  %v408_v37 = vpop.f32.mrb[0].mxu1 }
 0x19a   :  { %v837_v39 = vpop.f32.mrb[1].mxu0  ;;  %v409_v40 = vadd.f32 %v408_v37, %v304_v36  ;;  %v865_v41 = vpop.f32.mrb[1].mxu1 }
 0x19b   :  { %v307_v42 = vpop.f32.mrb[2].mxu0  ;;  %v411_v43 = vpop.f32.mrb[2].mxu1  ;;  %v637_v41 = vlaneseq }
 0x19c   :  { %v838_v44 = vpop.f32.mrb[3].mxu0  ;;  %v437_v45 = vadd.f32 %v774_v38, %v409_v40  ;;  %v412_v46 = vadd.f32 %v411_v43, %v307_v42  ;;  %v866_v47 = vpop.f32.mrb[3].mxu1  ;;  %v783_v42 = vld [vmem:[#allocation15] ss:$0 sm:$0xff] }
 0x19d   :  { %v626_v44 = vstv %s1520_s0  ;;  %s1229_s0 = smov [#allocation19]  }
 0x19e   :  { %v447_v48 = vmul.f32 0.70710677, %v437_v45  ;;  %v438_v49 = vadd.f32 %v774_v38, %v412_v46  ;;  %v442_v15 = vmul.f32 0.5, %v437_v45  ;;  %v1477_v45 = vand.u32 127, %v637_v41  ;;  %s739_s14 = sshll.u32 %s1229_s0, 4  ;;  %s740_s14 = int_to_ptr.vmem [resolvable:$true] %s739_s14 }
 0x19f   :  { %s1180_s21 = scalar_lea.vmem %s740_s14, 640  ;;  %p1185_p3 = scmp.lt.s32.totalorder %s740_s14, %s740_s14 }
 0x1a0   :  { %962 = verf.f32 %v447_v48  ;;  %v448_v50 = vmul.f32 0.70710677, %v438_v49  ;;  %v443_v16 = vmul.f32 0.5, %v438_v49  ;;  %vm639_vm1 = vcmp.lt.s32.totalorder %v1477_v45, 32  ;;  %p1181_p2 = scmp.ne.s32.totalorder %s740_s14, %s1180_s21  ;;  %p1186_p4 = scmp.lt.s32.totalorder %s1180_s21, %s1180_s21 }
 0x1a1   :  { %v312_v51 = vpop.f32.mrb[4].mxu0  ;;  %v416_v52 = vpop.f32.mrb[4].mxu1 }
 0x1a2   :  { %v841_v53 = vpop.f32.mrb[5].mxu0  ;;  %964 = verf.f32 %v448_v50  ;;  %v417_v54 = vadd.f32 %v416_v52, %v312_v51  ;;  %v869_v55 = vpop.f32.mrb[5].mxu1  ;;  %p1187_p5 = por %p1186_p4, %p1185_p3 }
 0x1a3   :  { %v315_v56 = vpop.f32.mrb[6].mxu0  ;;  %v419_v57 = vpop.f32.mrb[6].mxu1 }
 0x1a4   :  { %v842_v58 = vpop.f32.mrb[7].mxu0  ;;  %v439_v59 = vadd.f32 %v774_v38, %v417_v54  ;;  %v420_v60 = vadd.f32 %v419_v57, %v315_v56  ;;  %v870_v61 = vpop.f32.mrb[7].mxu1  ;;  %p1188_p6 = pnand %p1187_p5, %p1181_p2 }
 0x1a6   :  { %v449_v62 = vmul.f32 0.70710677, %v439_v59  ;;  %v440_v63 = vadd.f32 %v774_v38, %v420_v60  ;;  %v444_v30 = vmul.f32 0.5, %v439_v59 }
 0x1a8   :  { %966 = verf.f32 %v449_v62  ;;  %v450_v1 = vmul.f32 0.70710677, %v440_v63  ;;  %v445_v31 = vmul.f32 0.5, %v440_v63 }
 0x1a9   :  { %v320_v2 = vpop.f32.mrb[8].mxu0  ;;  %v424_v3 = vpop.f32.mrb[8].mxu1 }
 0x1aa   :  { %v845_v4 = vpop.f32.mrb[9].mxu0  ;;  %v963_v5 = vpop.eup %962  ;;  %968 = verf.f32 %v450_v1  ;;  %v425_v6 = vadd.f32 %v424_v3, %v320_v2 }
 0x1ab   :  { %v873_v7 = vpop.f32.mrb[9].mxu1  ;;  %v323_v8 = vpop.f32.mrb[10].mxu0  ;;  %v457_v9 = vadd.f32 1.0, %v963_v5 }
 0x1ac   :  { %v427_v10 = vpop.f32.mrb[10].mxu1  ;;  %v846_v11 = vpop.f32.mrb[11].mxu0  ;;  %v441_v13 = vadd.f32 %v774_v38, %v425_v6 }
 0x1ad   :  { %v965_v12 = vpop.eup %964  ;;  %v874_v14 = vpop.f32.mrb[11].mxu1  ;;  %v462_v21 = vmul.f32 %v457_v9, %v442_v15 }
 0x1ae   :  { %v458_v19 = vadd.f32 1.0, %v965_v12  ;;  %v451_v20 = vmul.f32 0.70710677, %v441_v13  ;;  %v446_v37 = vmul.f32 0.5, %v441_v13 }
 0x1b0   :  { %v463_v24 = vmul.f32 %v458_v19, %v443_v16  ;;  %970 = verf.f32 %v451_v20 }
 0x1b2   :  { %v472_v25 = vpack.c.bf16 %v463_v24, %v462_v21  ;;  %v967_v26 = vpop.eup %966 }
 0x1b3   :  { %v459_v28 = vadd.f32 1.0, %v967_v26 }
 0x1b4   :  { %892 = vmatmul.mubr.bf16.vlgmr.msra.gmra.mrb[12].mxu0 %v472_v25  ;;  %v969_v29 = vpop.eup %968 }
 0x1b5   :  { %v460_v32 = vadd.f32 1.0, %v969_v29  ;;  %v464_v33 = vmul.f32 %v459_v28, %v444_v30 }
 0x1b7   :  { %v465_v34 = vmul.f32 %v460_v32, %v445_v31 }
 0x1b9   :  { %v473_v35 = vpack.c.bf16 %v465_v34, %v464_v33 }
 0x1ba   :  { %v971_v36 = vpop.eup %970 }
 0x1bb   :  { %896 = vmatmul.mubr.bf16.vlgmr.msra.gmra.mrb[12].mxu1 %v473_v35  ;;  %v461_v38 = vadd.f32 1.0, %v971_v36 }
 0x1bc   :  { %899 = vmatprep.mubr.msk.bf16.mxu1 %vm1228_vm0, %v1227_v0 }
 0x1bd   :  { %v466_v39 = vmul.f32 %v461_v38, %v446_v37 }
 0x1bf   :  { %v474_v40 = vpack.c.bf16 %v466_v39, %v466_v39 }
 0x1c3   :  { %900 = vmatmul.mubr.bf16.gmra.mrb[16].mxu1 %v474_v40 }
 0x287   :  { %v573_v43 = vpop.f32.mrb[12].mxu0 }
 0x288   :  { %v621_v46 = vadd.f32 %v783_v42, %v573_v43  ;;  %v893_v47 = vpop.f32.mrb[13].mxu0 }
 0x289   :  { %v576_v48 = vpop.f32.mrb[14].mxu0 }
 0x28a   :  { %v627_v49 = vmul.f32 %v626_v44, %v621_v46  ;;  %v622_v50 = vadd.f32 %v783_v42, %v576_v48  ;;  %v894_v51 = vpop.f32.mrb[15].mxu0 }
 0x28b   :  { %v784_v51 = vld [vmem:[#allocation16] ss:$0 sm:$0xff] }
 0x28c   :  { %v628_v0 = vmul.f32 %v626_v44, %v622_v50  ;;  %v632_v52 = vadd.f32 %v627_v49, %v1427_v17 }
 0x28e   :  { %v640_v53 = vsel %vm639_vm1, %v632_v52, 0.0  ;;  %v633_v54 = vadd.f32 %v628_v0, %v1429_v18  ;;  %v581_v55 = vpop.f32.mrb[12].mxu1 }
 0x28f   :  { %645 = vadd.xlane.f32.xlu0 %v640_v53  ;;  %v623_v56 = vadd.f32 %v783_v42, %v581_v55  ;;  %v897_v57 = vpop.f32.mrb[13].mxu1 }
 0x290   :  { %v584_v58 = vpop.f32.mrb[14].mxu1  ;;  %v641_v62 = vsel %vm639_vm1, %v633_v54, 0.0 }
 0x291   :  { %v629_v59 = vmul.f32 %v626_v44, %v623_v56  ;;  %v624_v60 = vadd.f32 %v783_v42, %v584_v58  ;;  %v898_v61 = vpop.f32.mrb[15].mxu1 }
 0x293   :  { %647 = vadd.xlane.f32.xlu0 %v641_v62  ;;  %v630_v63 = vmul.f32 %v626_v44, %v624_v60  ;;  %v634_v17 = vadd.f32 %v629_v59, %v1440_v22 }
 0x295   :  { %v642_v1 = vsel %vm639_vm1, %v634_v17, 0.0  ;;  %v635_v18 = vadd.f32 %v630_v63, %v1442_v23 }
 0x296   :  { %649 = vadd.xlane.f32.xlu1 %v642_v1  ;;  %v589_v2 = vpop.f32.mrb[16].mxu1 }
 0x297   :  { %v625_v3 = vadd.f32 %v783_v42, %v589_v2  ;;  %v901_v4 = vpop.f32.mrb[17].mxu1  ;;  %v643_v8 = vsel %vm639_vm1, %v635_v18, 0.0 }
 0x298   :  { %v592_v5 = vpop.f32.mrb[18].mxu1 }
 0x299   :  { %v631_v6 = vmul.f32 %v626_v44, %v625_v3  ;;  %v902_v7 = vpop.f32.mrb[19].mxu1 }
 0x29a   :  { %651 = vadd.xlane.f32.xlu1 %v643_v8 }
 0x29b   :  { %v636_v9 = vadd.f32 %v631_v6, %v1454_v27 }
 0x29d   :  { %v644_v22 = vsel %vm639_vm1, %v636_v9, 0.0 }
 0x29e   :  { %653 = vadd.xlane.f32.xlu0 %v644_v22 }
 0x31c   :  { %v646_v10 = vpop.xlane.xlu0 %645 }
 0x31d   :  { %v655_v11 = vmul.f32 0.03125, %v646_v10 }
 0x31f   :  { %v660_v23 = vsub.f32 %v632_v52, %v655_v11 }
 0x320   :  { %v648_v12 = vpop.xlane.xlu0 %647 }
 0x321   :  { %v656_v13 = vmul.f32 0.03125, %v648_v12  ;;  %v665_v14 = vsel %vm639_vm1, %v660_v23, 0.0 }
 0x322   :  { %v670_v15 = vmul.f32 %v665_v14, %v665_v14 }
 0x323   :  { %v661_v16 = vsub.f32 %v633_v54, %v656_v13  ;;  %v650_v19 = vpop.xlane.xlu1 %649  ;;  %v785_v54 = vld [vmem:[#allocation18] ss:$0 sm:$0xff] }
 0x324   :  { %675 = vadd.xlane.f32.xlu1 %v670_v15  ;;  %v657_v20 = vmul.f32 0.03125, %v650_v19 }
 0x325   :  { %v666_v27 = vsel %vm639_vm1, %v661_v16, 0.0 }
 0x326   :  { %v671_v21 = vmul.f32 %v666_v27, %v666_v27  ;;  %v662_v24 = vsub.f32 %v634_v17, %v657_v20 }
 0x327   :  { %v652_v25 = vpop.xlane.xlu1 %651 }
 0x328   :  { %677 = vadd.xlane.f32.xlu0 %v671_v21  ;;  %v658_v26 = vmul.f32 0.03125, %v652_v25  ;;  %v667_v28 = vsel %vm639_vm1, %v662_v24, 0.0 }
 0x329   :  { %v672_v29 = vmul.f32 %v667_v28, %v667_v28 }
 0x32a   :  { %v663_v30 = vsub.f32 %v635_v18, %v658_v26 }
 0x32b   :  { %679 = vadd.xlane.f32.xlu1 %v672_v29  ;;  %v654_v31 = vpop.xlane.xlu0 %653 }
 0x32c   :  { %v659_v32 = vmul.f32 0.03125, %v654_v31  ;;  %v668_v33 = vsel %vm639_vm1, %v663_v30, 0.0 }
 0x32d   :  { %v673_v34 = vmul.f32 %v668_v33, %v668_v33 }
 0x32e   :  { %v664_v35 = vsub.f32 %v636_v9, %v659_v32 }
 0x32f   :  { %681 = vadd.xlane.f32.xlu0 %v673_v34 }
 0x330   :  { %v669_v36 = vsel %vm639_vm1, %v664_v35, 0.0 }
 0x331   :  { %v674_v37 = vmul.f32 %v669_v36, %v669_v36 }
 0x333   :  { %683 = vadd.xlane.f32.xlu1 %v674_v37 }
 0x3b1   :  { %v676_v38 = vpop.xlane.xlu1 %675 }
 0x3b2   :  { %v685_v39 = vmul.f32 0.03125, %v676_v38 }
 0x3b4   :  { %v690_v40 = vadd.f32 1e-05, %v685_v39 }
 0x3b5   :  { %v678_v41 = vpop.xlane.xlu0 %677 }
 0x3b6   :  { %972 = vrsqrt.f32 %v690_v40  ;;  %v686_v42 = vmul.f32 0.03125, %v678_v41 }
 0x3b8   :  { %v691_v43 = vadd.f32 1e-05, %v686_v42  ;;  %v680_v44 = vpop.xlane.xlu1 %679 }
 0x3b9   :  { %v687_v46 = vmul.f32 0.03125, %v680_v44 }
 0x3ba   :  { %974 = vrsqrt.f32 %v691_v43 }
 0x3bb   :  { %v692_v47 = vadd.f32 1e-05, %v687_v46 }
 0x3bc   :  { %v682_v48 = vpop.xlane.xlu0 %681 }
 0x3bd   :  { %976 = vrsqrt.f32 %v692_v47  ;;  %v688_v49 = vmul.f32 0.03125, %v682_v48 }
 0x3bf   :  { %v693_v45 = vadd.f32 1e-05, %v688_v49 }
 0x3c0   :  { %v973_v50 = vpop.eup %972  ;;  %v684_v52 = vpop.xlane.xlu1 %683 }
 0x3c1   :  { %v700_v0 = vmul.f32 %v973_v50, %v665_v14  ;;  %978 = vrsqrt.f32 %v693_v45  ;;  %v689_v53 = vmul.f32 0.03125, %v684_v52 }
 0x3c3   :  { %v712_v55 = vmul.f32 %v784_v51, %v700_v0  ;;  %v694_v57 = vadd.f32 1e-05, %v689_v53 }
 0x3c4   :  { %v975_v56 = vpop.eup %974 }
 0x3c5   :  { %v701_v58 = vmul.f32 %v975_v56, %v666_v27  ;;  %v724_v59 = vadd.f32 %v785_v54, %v712_v55  ;;  %980 = vrsqrt.f32 %v694_v57 }
 0x3c7   :  { %v713_v60 = vmul.f32 %v784_v51, %v701_v58  ;;  %729 = vst [vmem:[#allocation19] sm:$0xff] %v724_v59  ;;  %v977_v61 = vpop.eup %976 }
 0x3c8   :  { %v702_v62 = vmul.f32 %v977_v61, %v667_v28 }
 0x3c9   :  { %v725_v63 = vadd.f32 %v785_v54, %v713_v60 }
 0x3ca   :  { %v714_v17 = vmul.f32 %v784_v51, %v702_v62 }
 0x3cb   :  { %730 = vst [vmem:[#allocation19 + $0x8] sm:$0xff] %v725_v63  ;;  %v979_v1 = vpop.eup %978 }
 0x3cc   :  { %v703_v18 = vmul.f32 %v979_v1, %v668_v33  ;;  %v726_v2 = vadd.f32 %v785_v54, %v714_v17 }
 0x3ce   :  { %v715_v3 = vmul.f32 %v784_v51, %v703_v18  ;;  %731 = vst [vmem:[#allocation19 + $0x10] sm:$0xff] %v726_v2 }
 0x3cf   :  { %v981_v4 = vpop.eup %980 }
 0x3d0   :  { %v704_v5 = vmul.f32 %v981_v4, %v669_v36  ;;  %v727_v6 = vadd.f32 %v785_v54, %v715_v3 }
 0x3d2   :  { %v716_v7 = vmul.f32 %v784_v51, %v704_v5  ;;  %732 = vst [vmem:[#allocation19 + $0x18] sm:$0xff] %v727_v6 }
 0x3d4   :  { %v728_v8 = vadd.f32 %v785_v54, %v716_v7 }
 0x3d6   :  { %733 = vst [vmem:[#allocation19 + $0x20] sm:$0xff] %v728_v8 }
 0x3d7   :  { %1191 = shalt.err (!%p1188_p6)
}
 0x3d8   :  { %s1192_s22 = scalar_lea.hbm %s1530_s10, 640 }
 0x3d9   :  { %p1193_p7 = scmp.ne.s32.totalorder %s1530_s10, %s1192_s22  ;;  %p1196_p8 = scmp.lt.u32.totalorder %s1192_s22, %s1530_s10 }
 0x3db   :  { %p1198_p9 = pnand %p1196_p8, %p1193_p7 }
 0x3dd   :  { %1201 = shalt.err (!%p1198_p9)
}
 0x3de   :  { %745 = dma.vmem_to_hbm [thread:$0]  %s740_s14, 640, %s1530_s10, [#allocation6], %s1221_s8, %s1221_s8, %s1222_s13  }
 0x3df   :  { %1212 = dma.done.wait [#allocation6], 640  }
 0x3e0   :  { %1213 = vsyncadd [#allocation6], 4294966656 }
 0x3e1   :  { %749 = vsyncpa [#allocation5], 1 }
 0x3e2   :  { %750 = vsyncpa [#allocation8], 1 }
 0x3e3   :  { %751 = vsyncpa [#allocation11], 1 }
 0x3e4   :  { %752 = vsyncpa [#allocation14], 1 }
 0x3e5   :  { %753 = vsyncpa [#allocation17], 1 }
 0x3e6   :  { %754 = vsyncpa [#allocation6], 1 }

</bundles_post_ra>
